<compile_context>
chip_gen: v6e
topology: v6e:2x2x1
jax: 0.10.0
libtpu: 0.0.40
codegen_flags: <defaults>
</compile_context>

<pallas_src>
from functools import partial

import jax
import jax.numpy as jnp
from jax.experimental import pallas as pl
from jax.experimental.pallas import tpu as pltpu


def _sent_attention_kernel(x_ref, w_ref, b_ref, q_ref, out_ref, *, n_valid):
    # x_ref: (TB, N, D)   w_ref: (D, Q) bf16   b_ref: (1, Q) f32
    # q_ref: (1, Q) f32   out_ref: (TB, D)
    tb, n, d = x_ref.shape
    x = x_ref[...].astype(jnp.float32)                     # pooling path in f32

    # --- Projection: one bf16 MXU matmul over all TB*N word rows (f32 acc). ---
    # N is padded to a sublane multiple by the wrapper, so this reshape is a
    # layout-preserving no-op (no VMEM relayout copy).
    x2 = x.reshape(tb * n, d)
    proj = jnp.tanh(
        jnp.dot(x2.astype(jnp.bfloat16), w_ref[...],
                preferred_element_type=jnp.float32)
        + b_ref[...]
    )                                                      # (TB*N, Q) f32

    # --- Attention scores: VPU multiply + lane reduce (no width-1 MXU op). ---
    scores = jnp.sum(proj * q_ref[...], axis=-1, keepdims=True)   # (TB*N, 1)
    scores = scores.reshape(tb, n, 1)                              # (TB, N, 1)

    if n_valid < n:
        # Mask zero-padded word slots so they get zero softmax weight.
        word = jax.lax.broadcasted_iota(jnp.int32, (tb, n, 1), 1)
        scores = jnp.where(word < n_valid, scores, -jnp.inf)

    # --- Softmax over the word axis (sublane reduce, max-stabilized). ---
    m = jnp.max(scores, axis=1, keepdims=True)             # (TB, 1, 1)
    e = jnp.exp(scores - m)                                # (TB, N, 1)
    denom = jnp.sum(e, axis=1, keepdims=True)              # (TB, 1, 1)
    alpha = e * (1.0 / denom)                              # exact; denom is tiny

    # --- Weighted sum over words: broadcast multiply + sublane reduce. ---
    # TODO(synk): for large N (>= ~64 words) chunk this reduction over N blocks
    # (or use a batched MXU matmul) to avoid the (TB, N, D) f32 temporary.
    pooled = jnp.sum(alpha * x, axis=1)                    # (TB, D)
    out_ref[...] = pooled.astype(out_ref.dtype)


def _pick_tb(batch, n_words, d, itemsize, *, target_bytes=2 << 20, max_tb=512):
    """Batch tile: ~2 MiB of x per buffer (HBM-roofline sweet spot), a multiple
    of 8 (sublane-dense output), never padding tiny batches past one block, and
    split so grid_b >= 2 when the batch allows it (v7x has 2 TensorCores)."""
    row_bytes = max(n_words * d * itemsize, 1)
    tb = int(target_bytes // row_bytes)
    tb = max(8, (tb // 8) * 8)
    tb = min(tb, max_tb)
    b_up = ((batch + 7) // 8) * 8
    tb = min(tb, b_up)
    if b_up >= 16 and tb >= b_up:          # would otherwise give a single grid step
        tb = max(8, (((b_up + 1) // 2 + 7) // 8) * 8)
    return tb


def sent_embedding(x, w, b, q, *, tb=None):
    """Attention pooling.  x: (B, N, D) -> (B, 1, D) (same dtype as x)."""
    B, N, D = x.shape
    Q = w.shape[1]
    itemsize = jnp.dtype(x.dtype).itemsize

    # Pad the word axis to a sublane multiple so the in-kernel flatten of
    # (TB, N, D) -> (TB*N, D) never triggers a VMEM relayout copy.
    n_pad = max(8, ((N + 7) // 8) * 8)
    if n_pad != N:
        x = jnp.pad(x, ((0, 0), (0, n_pad - N), (0, 0)))

    if tb is None:
        tb = _pick_tb(B, n_pad, D, itemsize)
    grid_b = pl.cdiv(B, tb)
    Bp = grid_b * tb
    if Bp != B:
        # Zero-pad the batch; padded sentences are benign and sliced off.
        x = jnp.pad(x, ((0, Bp - B), (0, 0), (0, 0)))

    # Cast parameters to their compute dtype ONCE here (not per grid step);
    # they stay VMEM-resident via the constant index maps below.
    w_c = w.astype(jnp.bfloat16)            # MXU operand
    b2 = b.reshape(1, Q).astype(jnp.float32)
    q2 = q.reshape(1, Q).astype(jnp.float32)

    # Scoped-VMEM budget: double-buffered x tile + f32 copy + proj + alpha*x
    # temp + output slab, with headroom.  Kept well under v7x's 64 MiB physical;
    # explicitly raised above v5e's 16 MiB scoped default.
    x_tile = tb * n_pad * D * itemsize
    est = (2 * x_tile + 2 * tb * n_pad * D * 4 + 2 * tb * n_pad * Q * 4
           + 2 * tb * D * 4 + 4 * D * Q * 2 + (2 << 20))
    vmem_limit = int(min(max(est, 32 << 20), 48 << 20))

    kernel = partial(_sent_attention_kernel, n_valid=N)

    out2d = pl.pallas_call(
        kernel,
        out_shape=jax.ShapeDtypeStruct((Bp, D), x.dtype),
        grid_spec=pltpu.PrefetchScalarGridSpec(
            num_scalar_prefetch=0,
            grid=(grid_b,),
            in_specs=[
                # TODO(synk): if the calling model can feed x as bfloat16 from
                # HBM, the kernel (HBM-bound on x) gets ~2x faster as-is.
                pl.BlockSpec((tb, n_pad, D), lambda bi: (bi, 0, 0)),
                # W / b / q are grid-invariant (constant index maps) and stay
                # resident in VMEM across the batch loop.
                pl.BlockSpec((D, Q), lambda bi: (0, 0)),
                pl.BlockSpec((1, Q), lambda bi: (0, 0)),
                pl.BlockSpec((1, Q), lambda bi: (0, 0)),
            ],
            out_specs=pl.BlockSpec((tb, D), lambda bi: (bi, 0)),
        ),
        compiler_params=pltpu.CompilerParams(
            dimension_semantics=("parallel",),
            vmem_limit_bytes=vmem_limit,
        ),
    )(x, w_c, b2, q2)

    return out2d[:B].reshape(B, 1, D)


def _reference(x, w, b, q):
    # True f32 reference (HIGHEST precision so the TPU doesn't silently use
    # bf16 matmul passes in the reference itself).
    hp = jax.lax.Precision.HIGHEST
    proj = jnp.tanh(jnp.einsum("bnd,dq->bnq", x, w, precision=hp) + b)
    scores = jnp.einsum("bnq,q->bn", proj, q, precision=hp)
    alpha = jax.nn.softmax(scores, axis=1)
    return jnp.einsum("bn,bnd->bd", alpha, x, precision=hp)[:, None, :]


if __name__ == "__main__":
    # Small deterministic shapes consistent with the module:
    # batch=2 sentences, n=8 words, word_embedding_dim=512, query_dim=128.
    B, N, D, Q = 2, 8, 512, 128
    key = jax.random.PRNGKey(0)
    kx, kw, kb, kq = jax.random.split(key, 4)

    x = jax.random.normal(kx, (B, N, D), dtype=jnp.float32)
    # Attention parameters (Linear(D, Q) + query vector), deterministic init.
    w = jax.random.normal(kw, (D, Q), dtype=jnp.float32) * 0.05
    b = jax.random.normal(kb, (Q,), dtype=jnp.float32) * 0.05
    q = jax.random.uniform(kq, (Q,), dtype=jnp.float32, minval=-0.1, maxval=0.1)

    out = jax.block_until_ready(sent_embedding(x, w, b, q))
    ref = _reference(x, w, b, q)

    assert out.shape == (B, 1, D)
    # Tolerance sized for bf16 MXU inputs (f32 accumulation) vs a full-f32
    # reference; measured error is ~1e-3 absolute, so 2e-2 has ample margin.
    assert jnp.allclose(out, ref, atol=2e-2, rtol=2e-2)
    print("KERNEL_OK")
</pallas_src>

<mosaic_0001>
module attributes {stable_mosaic.version = 11 : i64} {
  func.func @_sent_attention_kernel(%arg0: i32, %arg1: memref<8x8x512xf32, #tpu.memory_space<vmem>>, %arg2: memref<512x128xbf16, #tpu.memory_space<vmem>>, %arg3: memref<1x128xf32, #tpu.memory_space<vmem>>, %arg4: memref<1x128xf32, #tpu.memory_space<vmem>>, %arg5: memref<8x512xf32, #tpu.memory_space<vmem>>) attributes {dimension_semantics = [#tpu.dimension_semantics<parallel>], iteration_bounds = array<i64: 1>, scalar_prefetch = 0 : i64, scratch_operands = 0 : i64, tpu.core_type = #tpu.core_type<tc>, window_params = [{transform_indices = @transform_0, window_bounds = array<i64: 8, 8, 512>}, {pipeline_mode = #tpu.pipeline_mode<synchronous>, transform_indices = @transform_1, window_bounds = array<i64: 512, 128>}, {pipeline_mode = #tpu.pipeline_mode<synchronous>, transform_indices = @transform_2, window_bounds = array<i64: 1, 128>}, {pipeline_mode = #tpu.pipeline_mode<synchronous>, transform_indices = @transform_3, window_bounds = array<i64: 1, 128>}, {transform_indices = @transform_4, window_bounds = array<i64: 8, 512>}]} {
    %c0 = arith.constant 0 : index
    %c0_0 = arith.constant 0 : index
    %c0_1 = arith.constant 0 : index
    %0 = vector.load %arg1[%c0, %c0_0, %c0_1] : memref<8x8x512xf32, #tpu.memory_space<vmem>>, vector<8x8x512xf32>
    %1 = vector.shape_cast %0 : vector<8x8x512xf32> to vector<64x512xf32>
    %2 = arith.truncf %1 : vector<64x512xf32> to vector<64x512xbf16>
    %c0_2 = arith.constant 0 : index
    %c0_3 = arith.constant 0 : index
    %3 = vector.load %arg2[%c0_2, %c0_3] : memref<512x128xbf16, #tpu.memory_space<vmem>>, vector<512x128xbf16>
    %cst = arith.constant dense<0.000000e+00> : vector<64x128xf32>
    %4 = tpu.matmul %2, %3, %cst {dimension_numbers = #tpu.dot_dimension_numbers<[1], [0], [0], [1], [0, 0, 1, 1], [], []>} : vector<64x512xbf16>, vector<512x128xbf16>, vector<64x128xf32> -> vector<64x128xf32>
    %c0_4 = arith.constant 0 : index
    %c0_5 = arith.constant 0 : index
    %5 = vector.load %arg3[%c0_4, %c0_5] : memref<1x128xf32, #tpu.memory_space<vmem>>, vector<1x128xf32>
    %6 = vector.broadcast %5 : vector<1x128xf32> to vector<64x128xf32>
    %7 = arith.addf %4, %6 : vector<64x128xf32>
    %8 = math.tanh %7 : vector<64x128xf32>
    %c0_6 = arith.constant 0 : index
    %c0_7 = arith.constant 0 : index
    %9 = vector.load %arg4[%c0_6, %c0_7] : memref<1x128xf32, #tpu.memory_space<vmem>>, vector<1x128xf32>
    %10 = vector.broadcast %9 : vector<1x128xf32> to vector<64x128xf32>
    %11 = arith.mulf %8, %10 : vector<64x128xf32>
    %cst_8 = arith.constant dense<0.000000e+00> : vector<64xf32>
    %12 = vector.multi_reduction <add>, %11, %cst_8 [1] : vector<64x128xf32> to vector<64xf32>
    %13 = vector.shape_cast %12 : vector<64xf32> to vector<64x1xf32>
    %14 = vector.shape_cast %13 : vector<64x1xf32> to vector<8x8x1xf32>
    %cst_9 = arith.constant dense<0xFF800000> : vector<8x1xf32>
    %15 = vector.multi_reduction <maximumf>, %14, %cst_9 [1] : vector<8x8x1xf32> to vector<8x1xf32>
    %16 = vector.shape_cast %15 : vector<8x1xf32> to vector<8x1x1xf32>
    %17 = vector.broadcast %16 : vector<8x1x1xf32> to vector<8x8x1xf32>
    %18 = arith.subf %14, %17 : vector<8x8x1xf32>
    %19 = math.exp %18 : vector<8x8x1xf32>
    %cst_10 = arith.constant dense<0.000000e+00> : vector<8x1xf32>
    %20 = vector.multi_reduction <add>, %19, %cst_10 [1] : vector<8x8x1xf32> to vector<8x1xf32>
    %21 = vector.shape_cast %20 : vector<8x1xf32> to vector<8x1x1xf32>
    %cst_11 = arith.constant 1.000000e+00 : f32
    %22 = vector.broadcast %cst_11 : f32 to vector<8x1x1xf32>
    %23 = arith.divf %22, %21 : vector<8x1x1xf32>
    %24 = vector.broadcast %23 : vector<8x1x1xf32> to vector<8x8x1xf32>
    %25 = arith.mulf %19, %24 : vector<8x8x1xf32>
    %26 = vector.broadcast %25 : vector<8x8x1xf32> to vector<8x8x512xf32>
    %27 = arith.mulf %26, %0 : vector<8x8x512xf32>
    %cst_12 = arith.constant dense<0.000000e+00> : vector<8x512xf32>
    %28 = vector.multi_reduction <add>, %27, %cst_12 [1] : vector<8x8x512xf32> to vector<8x512xf32>
    %c0_13 = arith.constant 0 : index
    %c0_14 = arith.constant 0 : index
    %29 = vector.load %arg5[%c0_13, %c0_14] : memref<8x512xf32, #tpu.memory_space<vmem>>, vector<8x512xf32>
    tpu.vector_store %arg5[%c0_13, %c0_14], %28 {strides = array<i32>} : memref<8x512xf32, #tpu.memory_space<vmem>>, vector<8x512xf32>,
    return
  }
  func.func @transform_0(%arg0: i32) -> (i32, i32, i32) {
    %c0_i32 = arith.constant 0 : i32
    %c0_i32_0 = arith.constant 0 : i32
    %c0_i32_1 = arith.constant 0 : i32
    return %arg0, %c0_i32, %c0_i32_0 : i32, i32, i32
  }
  func.func @transform_1(%arg0: i32) -> (i32, i32) {
    %c0_i32 = arith.constant 0 : i32
    %c0_i32_0 = arith.constant 0 : i32
    %c0_i32_1 = arith.constant 0 : i32
    return %c0_i32, %c0_i32_0 : i32, i32
  }
  func.func @transform_2(%arg0: i32) -> (i32, i32) {
    %c0_i32 = arith.constant 0 : i32
    %c0_i32_0 = arith.constant 0 : i32
    %c0_i32_1 = arith.constant 0 : i32
    return %c0_i32, %c0_i32_0 : i32, i32
  }
  func.func @transform_3(%arg0: i32) -> (i32, i32) {
    %c0_i32 = arith.constant 0 : i32
    %c0_i32_0 = arith.constant 0 : i32
    %c0_i32_1 = arith.constant 0 : i32
    return %c0_i32, %c0_i32_0 : i32, i32
  }
  func.func @transform_4(%arg0: i32) -> (i32, i32) {
    %c0_i32 = arith.constant 0 : i32
    %c0_i32_0 = arith.constant 0 : i32
    return %arg0, %c0_i32 : i32, i32
  }
}

</mosaic_0001>

<bundles_post_ra>
// kernel: tpu_custom_call.1
= control target key start
LH: loop header
LB: loop body
LE: loop exit
PB: predicated region body
PF: predicated region fallthrough
CT: control target
= control target key end

     0   :  { %9 = vsyncpa [#allocation3], 0  ;;  %s1670_s0 = inlined_call_operand.hbm [shape: f32[8,8,512], index: 0, kind: input, shape index: {}]   ;;  %s1671_s1 = inlined_call_operand.hbm [shape: bf16[512,128], index: 1, kind: input, shape index: {}]   ;;  %s1672_s2 = inlined_call_operand.vmem [shape: f32[1,128], index: 2, kind: input, shape index: {}]   ;;  %s1673_s3 = inlined_call_operand.vmem [shape: f32[1,128], index: 3, kind: input, shape index: {}]   ;;  %s1674_s4 = inlined_call_operand.hbm [shape: f32[8,512], index: 4, kind: output, shape index: {}]  }
   0x1   :  { %10 = vsyncpa [#allocation6], 0 }
   0x2   :  { %11 = vsyncpa [#allocation4], 0  ;;  %s1253_s15 = smov [#allocation2]  }
   0x3   :  { %s17_s16 = sshll.u32 %s1253_s15, 4  ;;  %s18_s16 = int_to_ptr.vmem [resolvable:$true] %s17_s16 }
   0x4   :  { %s1195_s17 = scalar_lea.vmem %s18_s16, 4096  ;;  %p1200_p1 = scmp.lt.s32.totalorder %s18_s16, %s18_s16 }
   0x5   :  { %p1196_p0 = scmp.ne.s32.totalorder %s18_s16, %s1195_s17  ;;  %p1201_p2 = scmp.lt.s32.totalorder %s1195_s17, %s1195_s17 }
   0x7   :  { %p1202_p3 = por %p1201_p2, %p1200_p1 }
   0x9   :  { %p1203_p4 = pnand %p1202_p3, %p1196_p0 }
   0xb   :  { %1206 = shalt.err (!%p1203_p4)
}
   0xc   :  { %s1254_s18 = smov 512   ;;  %s1255_s19 = smov 32  }
   0xd   :  { %23 = dma.hbm_to_vmem [thread:$0]  %s1670_s0, 4096, %s18_s16, [#allocation3], %s1254_s18, %s1254_s18, %s1255_s19  }
   0xe   :  { %s1256_s22 = smov [#allocation5]  }
   0xf   :  { %s29_s23 = sshll.u32 %s1256_s22, 4  ;;  %s30_s23 = int_to_ptr.vmem [resolvable:$true] %s29_s23 }
  0x10   :  { %s1215_s24 = scalar_lea.vmem %s30_s23, 4096  ;;  %p1220_p6 = scmp.lt.s32.totalorder %s30_s23, %s30_s23 }
  0x11   :  { %p1216_p5 = scmp.ne.s32.totalorder %s30_s23, %s1215_s24  ;;  %p1221_p7 = scmp.lt.s32.totalorder %s1215_s24, %s1215_s24 }
  0x13   :  { %p1222_p8 = por %p1221_p7, %p1220_p6 }
  0x15   :  { %p1223_p9 = pnand %p1222_p8, %p1216_p5 }
  0x17   :  { %1226 = shalt.err (!%p1223_p9)
}
  0x18   :  { %s1257_s25 = smov 64   ;;  %s1258_s26 = smov 4  }
  0x19   :  { %35 = dma.hbm_to_vmem [thread:$0]  %s1671_s1, 4096, %s30_s23, [#allocation6], %s1257_s25, %s1257_s25, %s1258_s26  }
  0x1a   :  { %1247 = dma.done.wait [#allocation3], 4096  }
  0x1b   :  { %1248 = vsyncadd [#allocation3], 4294963200 }
  0x1c   :  { %1249 = dma.done.wait [#allocation6], 4096  }
  0x1d   :  { %1250 = vsyncadd [#allocation6], 4294963200  ;;  %v1107_v0 = vld [vmem:[#allocation5 + $0x78] sm:$0xff]   ;;  %v1111_v4 = vld [vmem:[#allocation5 + $0x70] sm:$0xff]   ;;  %vm927_vm0 = vcmask 1041409   ;;  %vm929_vm1 = vcmask 1042434  }
  0x1e   :  { %v1108_v1 = vld [vmem:[#allocation5 + $0xf8] sm:$0xff]   ;;  %1020 = vmatprep.subr.bf16.mxu0 %v1107_v0  ;;  %v1112_v5 = vld [vmem:[#allocation5 + $0xf0] sm:$0xff]   ;;  %v1115_v8 = vld [vmem:[#allocation5 + $0x68] sm:$0xff]   ;;  %vm931_vm2 = vcmask 1043459   ;;  %vm933_vm3 = vcmask 1044484   ;;  %vm935_vm4 = vcmask 1045509  }
  0x1f   :  { %v1109_v2 = vld [vmem:[#allocation5 + $0x38] sm:$0xff]   ;;  %1060 = vmatprep.subr.bf16.mxu1 %v1108_v1  ;;  %v1113_v6 = vld [vmem:[#allocation5 + $0x30] sm:$0xff]   ;;  %v1116_v9 = vld [vmem:[#allocation5 + $0xe8] sm:$0xff]   ;;  %vm937_vm5 = vcmask 1046534   ;;  %vm939_vm6 = vcmask 1047559  }
  0x20   :  { %v1110_v3 = vld [vmem:[#allocation5 + $0xb8] sm:$0xff]   ;;  %1021 = vmatpush3.bf16.msra.mxu0 %v1109_v2  ;;  %v1114_v7 = vld [vmem:[#allocation5 + $0xb0] sm:$0xff]   ;;  %v1117_v10 = vld [vmem:[#allocation5 + $0x28] sm:$0xff]  }
  0x21   :  { %1061 = vmatpush3.bf16.msra.mxu1 %v1110_v3  ;;  %1022 = vmatprep.subr.bf16.mxu0 %v1111_v4  ;;  %v1118_v11 = vld [vmem:[#allocation5 + $0xa8] sm:$0xff]   ;;  %v1119_v12 = vld [vmem:[#allocation5 + $0x60] sm:$0xff]   ;;  %v1123_v16 = vld [vmem:[#allocation5 + $0x58] sm:$0xff]  }
  0x22   :  { %1062 = vmatprep.subr.bf16.mxu1 %v1112_v5  ;;  %v1120_v13 = vld [vmem:[#allocation5 + $0xe0] sm:$0xff]   ;;  %v1124_v17 = vld [vmem:[#allocation5 + $0xd8] sm:$0xff]   ;;  %v1127_v20 = vld [vmem:[#allocation5 + $0x50] sm:$0xff]  }
  0x23   :  { %v1121_v14 = vld [vmem:[#allocation5 + $0x20] sm:$0xff]   ;;  %v1125_v18 = vld [vmem:[#allocation5 + $0x18] sm:$0xff]   ;;  %v1128_v21 = vld [vmem:[#allocation5 + $0xd0] sm:$0xff]  }
  0x24   :  { %1023 = vmatpush3.bf16.msra.mxu0 %v1113_v6  ;;  %v1122_v15 = vld [vmem:[#allocation5 + $0xa0] sm:$0xff]   ;;  %v1126_v19 = vld [vmem:[#allocation5 + $0x98] sm:$0xff]   ;;  %v1129_v22 = vld [vmem:[#allocation5 + $0x10] sm:$0xff]  }
  0x25   :  { %1063 = vmatpush3.bf16.msra.mxu1 %v1114_v7  ;;  %1024 = vmatprep.subr.bf16.mxu0 %v1115_v8  ;;  %v1130_v23 = vld [vmem:[#allocation5 + $0x90] sm:$0xff]   ;;  %v1131_v24 = vld [vmem:[#allocation5 + $0x48] sm:$0xff]   ;;  %v1135_v28 = vld [vmem:[#allocation5 + $0x40] sm:$0xff]  }
  0x26   :  { %1064 = vmatprep.subr.bf16.mxu1 %v1116_v9  ;;  %v1132_v25 = vld [vmem:[#allocation5 + $0xc8] sm:$0xff]   ;;  %v1136_v29 = vld [vmem:[#allocation5 + $0xc0] sm:$0xff]   ;;  %v1295_v34 = vld [vmem:[#allocation2 + $0x18] sm:$0xff] }
  0x27   :  { %v1133_v26 = vld [vmem:[#allocation5 + $0x8] sm:$0xff]   ;;  %v1137_v30 = vld [vmem:[#allocation5] sm:$0xff]   ;;  %v1299_v36 = vld [vmem:[#allocation2 + $0x38] sm:$0xff] }
  0x28   :  { %1025 = vmatpush3.bf16.msra.mxu0 %v1117_v10  ;;  %v1134_v27 = vld [vmem:[#allocation5 + $0x88] sm:$0xff]   ;;  %v1138_v31 = vld [vmem:[#allocation5 + $0x80] sm:$0xff]   ;;  %v82_v39 = vpack.c.bf16 %v1299_v36, %v1295_v34  ;;  %v1309_v41 = vld [vmem:[#allocation2 + $0x10] sm:$0xff] }
  0x29   :  { %1065 = vmatpush3.bf16.msra.mxu1 %v1118_v11  ;;  %1026 = vmatprep.subr.bf16.mxu0 %v1119_v12  ;;  %v1291_v32 = vld [vmem:[#allocation2 + $0x8] sm:$0xff]  ;;  %v1301_v37 = vld [vmem:[#allocation2] sm:$0xff]  ;;  %v1311_v42 = vld [vmem:[#allocation2 + $0x30] sm:$0xff] }
  0x2a   :  { %1066 = vmatprep.subr.bf16.mxu1 %v1120_v13  ;;  %v1293_v33 = vld [vmem:[#allocation2 + $0x28] sm:$0xff]  ;;  %v1303_v38 = vld [vmem:[#allocation2 + $0x20] sm:$0xff]  ;;  %v81_v44 = vpack.c.bf16 %v1311_v42, %v1309_v41  ;;  %v1319_v46 = vld [vmem:[#allocation2 + $0x58] sm:$0xff]  ;;  %455 = vmatprep.mubr.bf16.mxu1 %v82_v39 }
  0x2b   :  { %v80_v35 = vpack.c.bf16 %v1293_v33, %v1291_v32  ;;  %v79_v40 = vpack.c.bf16 %v1303_v38, %v1301_v37  ;;  %v1313_v43 = vld [vmem:[#allocation2 + $0x48] sm:$0xff]  ;;  %v1321_v47 = vld [vmem:[#allocation2 + $0x78] sm:$0xff]  ;;  %v1327_v50 = vld [vmem:[#allocation2 + $0x40] sm:$0xff] }
  0x2c   :  { %1027 = vmatpush3.bf16.msra.mxu0 %v1121_v14  ;;  %v1317_v45 = vld [vmem:[#allocation2 + $0x68] sm:$0xff]  ;;  %v86_v49 = vpack.c.bf16 %v1321_v47, %v1319_v46  ;;  %v1329_v51 = vld [vmem:[#allocation2 + $0x60] sm:$0xff]  ;;  %v1331_v52 = vld [vmem:[#allocation2 + $0x50] sm:$0xff] }
  0x2d   :  { %1067 = vmatpush3.bf16.msra.mxu1 %v1122_v15  ;;  %1028 = vmatprep.subr.bf16.mxu0 %v1123_v16  ;;  %v84_v48 = vpack.c.bf16 %v1317_v45, %v1313_v43  ;;  %v1333_v53 = vld [vmem:[#allocation2 + $0x70] sm:$0xff]  ;;  %v1335_v54 = vld [vmem:[#allocation2 + $0x88] sm:$0xff]  ;;  %v1339_v56 = vld [vmem:[#allocation2 + $0x98] sm:$0xff]  ;;  %v83_v58 = vpack.c.bf16 %v1329_v51, %v1327_v50 }
  0x2e   :  { %1068 = vmatprep.subr.bf16.mxu1 %v1124_v17  ;;  %390 = vmatprep.mubr.bf16.mxu0 %v80_v35  ;;  %v1337_v55 = vld [vmem:[#allocation2 + $0xa8] sm:$0xff]  ;;  %v1341_v57 = vld [vmem:[#allocation2 + $0xb8] sm:$0xff]  ;;  %v85_v59 = vpack.c.bf16 %v1333_v53, %v1331_v52  ;;  %v1351_v62 = vld [vmem:[#allocation2 + $0x80] sm:$0xff] }
  0x2f   :  { %v88_v60 = vpack.c.bf16 %v1337_v55, %v1335_v54  ;;  %v90_v61 = vpack.c.bf16 %v1341_v57, %v1339_v56  ;;  %v1353_v63 = vld [vmem:[#allocation2 + $0xa0] sm:$0xff]  ;;  %v1355_v0 = vld [vmem:[#allocation2 + $0x90] sm:$0xff]  ;;  %v1359_v2 = vld [vmem:[#allocation2 + $0xc8] sm:$0xff] }
  0x30   :  { %1029 = vmatpush3.bf16.msra.mxu0 %v1125_v18  ;;  %v1357_v1 = vld [vmem:[#allocation2 + $0xb0] sm:$0xff]  ;;  %v1361_v3 = vld [vmem:[#allocation2 + $0xe8] sm:$0xff]  ;;  %v1363_v4 = vld [vmem:[#allocation2 + $0xd8] sm:$0xff]  ;;  %v87_v6 = vpack.c.bf16 %v1353_v63, %v1351_v62 }
  0x31   :  { %1069 = vmatpush3.bf16.msra.mxu1 %v1126_v19  ;;  %1030 = vmatprep.subr.bf16.mxu0 %v1127_v20  ;;  %v1365_v5 = vld [vmem:[#allocation2 + $0xf8] sm:$0xff]  ;;  %v89_v7 = vpack.c.bf16 %v1357_v1, %v1355_v0  ;;  %v92_v8 = vpack.c.bf16 %v1361_v3, %v1359_v2  ;;  %v1375_v10 = vld [vmem:[#allocation2 + $0xc0] sm:$0xff]  ;;  %v1379_v12 = vld [vmem:[#allocation2 + $0xd0] sm:$0xff] }
  0x32   :  { %1070 = vmatprep.subr.bf16.mxu1 %v1128_v21  ;;  %v94_v9 = vpack.c.bf16 %v1365_v5, %v1363_v4  ;;  %v1377_v11 = vld [vmem:[#allocation2 + $0xe0] sm:$0xff]  ;;  %v1381_v13 = vld [vmem:[#allocation2 + $0xf0] sm:$0xff] }
  0x33   :  { %v91_v14 = vpack.c.bf16 %v1377_v11, %v1375_v10  ;;  %v93_v15 = vpack.c.bf16 %v1381_v13, %v1379_v12  ;;  %v1390_v18 = vld [vmem:[%s1672_s2] ss:$0 sm:$0xff] }
  0x34   :  { %1031 = vmatpush3.bf16.msra.mxu0 %v1129_v22 }
  0x35   :  { %1071 = vmatpush3.bf16.msra.mxu1 %v1130_v23  ;;  %1032 = vmatprep.subr.bf16.mxu0 %v1131_v24 }
  0x36   :  { %1072 = vmatprep.subr.bf16.mxu1 %v1132_v25 }
  0x38   :  { %1033 = vmatpush3.bf16.msra.mxu0 %v1133_v26 }
  0x39   :  { %1073 = vmatpush3.bf16.msra.mxu1 %v1134_v27  ;;  %1034 = vmatprep.subr.bf16.mxu0 %v1135_v28 }
  0x3a   :  { %1074 = vmatprep.subr.bf16.mxu1 %v1136_v29 }
  0x3c   :  { %1035 = vmatpush3.bf16.msra.mxu0 %v1137_v30 }
  0x3d   :  { %1075 = vmatpush3.bf16.msra.mxu1 %v1138_v31 }
  0x3f   :  { %391 = vmatmul.mubr.bf16.vlgmr.msra.gmra.mxu0 %v79_v40 }
  0x40   :  { %456 = vmatmul.mubr.bf16.vlgmr.msra.gmra.mxu1 %v81_v44  ;;  %398 = vmatprep.mubr.bf16.mxu0 %v84_v48 }
  0x41   :  { %463 = vmatprep.mubr.bf16.mxu1 %v86_v49 }
  0x47   :  { %399 = vmatmul.mubr.bf16.gmra.mxu0 %v83_v58 }
  0x48   :  { %464 = vmatmul.mubr.bf16.gmra.mxu1 %v85_v59  ;;  %406 = vmatprep.mubr.bf16.mxu0 %v88_v60 }
  0x49   :  { %471 = vmatprep.mubr.bf16.mxu1 %v90_v61 }
  0x4f   :  { %407 = vmatmul.mubr.bf16.gmra.mxu0 %v87_v6 }
  0x50   :  { %472 = vmatmul.mubr.bf16.gmra.mxu1 %v89_v7  ;;  %414 = vmatprep.mubr.bf16.mxu0 %v92_v8 }
  0x51   :  { %479 = vmatprep.mubr.bf16.mxu1 %v94_v9 }
  0x57   :  { %415 = vmatmul.mubr.bf16.gmra.mxu0 %v91_v14 }
  0x58   :  { %480 = vmatmul.mubr.bf16.gmra.mxu1 %v93_v15 }
  0xff   :  { %v1036_v16 = vpop.f32.mrf.mxu0 }
 0x100   :  { %v1076_v17 = vpop.f32.mrf.mxu1 }
 0x101   :  { %v1037_v19 = vpop.f32.mrf.mxu0 }
 0x102   :  { %v1038_v20 = vadd.f32 %v1037_v19, %v1036_v16  ;;  %v1077_v21 = vpop.f32.mrf.mxu1 }
 0x103   :  { %v1039_v22 = vpop.f32.mrf.mxu0  ;;  %v1078_v24 = vadd.f32 %v1077_v21, %v1076_v17 }
 0x104   :  { %v393_v23 = vadd.f32 %v1038_v20, %v1390_v18  ;;  %v1079_v25 = vpop.f32.mrf.mxu1 }
 0x105   :  { %v1040_v26 = vpop.f32.mrf.mxu0 }
 0x106   :  { %v458_v27 = vadd.f32 %v1078_v24, %v393_v23  ;;  %v1041_v28 = vadd.f32 %v1040_v26, %v1039_v22  ;;  %v1080_v29 = vpop.f32.mrf.mxu1  ;;  %v1019_v24 = vld [vmem:[%s1673_s3] ss:$0 sm:$0xff]  ;;  %s1259_s3 = smov [#allocation7]  }
 0x107   :  { %v1042_v30 = vpop.f32.mrf.mxu0  ;;  %v1081_v35 = vadd.f32 %v1080_v29, %v1079_v25  ;;  %s976_s30 = sshll.u32 %s1259_s3, 4  ;;  %s977_s30 = int_to_ptr.vmem [resolvable:$true] %s976_s30 }
 0x108   :  { %1139 = vtanh.f32 %v458_v27  ;;  %v396_v31 = vadd.f32 %v1041_v28, %v1390_v18  ;;  %v1082_v39 = vpop.f32.mrf.mxu1  ;;  %s1227_s5 = scalar_lea.vmem %s977_s30, 512  ;;  %p1232_p11 = scmp.lt.s32.totalorder %s977_s30, %s977_s30 }
 0x109   :  { %v1043_v40 = vpop.f32.mrf.mxu0  ;;  %p1228_p10 = scmp.ne.s32.totalorder %s977_s30, %s1227_s5  ;;  %p1233_p12 = scmp.lt.s32.totalorder %s1227_s5, %s1227_s5 }
 0x10a   :  { %v461_v44 = vadd.f32 %v1081_v35, %v396_v31  ;;  %v1044_v48 = vadd.f32 %v1043_v40, %v1042_v30  ;;  %v1083_v49 = vpop.f32.mrf.mxu1 }
 0x10b   :  { %v1045_v58 = vpop.f32.mrf.mxu0  ;;  %v1084_v60 = vadd.f32 %v1083_v49, %v1082_v39  ;;  %p1234_p13 = por %p1233_p12, %p1232_p11 }
 0x10c   :  { %1141 = vtanh.f32 %v461_v44  ;;  %v401_v59 = vadd.f32 %v1044_v48, %v1390_v18  ;;  %v1085_v61 = vpop.f32.mrf.mxu1 }
 0x10d   :  { %v1046_v6 = vpop.f32.mrf.mxu0  ;;  %p1235_p0 = pnand %p1234_p13, %p1228_p10 }
 0x10e   :  { %v466_v7 = vadd.f32 %v1084_v60, %v401_v59  ;;  %v1047_v8 = vadd.f32 %v1046_v6, %v1045_v58  ;;  %v1086_v9 = vpop.f32.mrf.mxu1 }
 0x10f   :  { %v1048_v14 = vpop.f32.mrf.mxu0  ;;  %v1087_v16 = vadd.f32 %v1086_v9, %v1085_v61 }
 0x110   :  { %1143 = vtanh.f32 %v466_v7  ;;  %v404_v15 = vadd.f32 %v1047_v8, %v1390_v18  ;;  %v1088_v17 = vpop.f32.mrf.mxu1 }
 0x111   :  { %v1049_v19 = vpop.f32.mrf.mxu0 }
 0x112   :  { %v469_v20 = vadd.f32 %v1087_v16, %v404_v15  ;;  %v1050_v21 = vadd.f32 %v1049_v19, %v1048_v14  ;;  %v1089_v22 = vpop.f32.mrf.mxu1 }
 0x113   :  { %v1051_v23 = vpop.f32.mrf.mxu0  ;;  %v1090_v26 = vadd.f32 %v1089_v22, %v1088_v17 }
 0x114   :  { %1145 = vtanh.f32 %v469_v20  ;;  %v409_v25 = vadd.f32 %v1050_v21, %v1390_v18  ;;  %v1091_v27 = vpop.f32.mrf.mxu1 }
 0x115   :  { %v1140_v28 = vpop.eup %1139  ;;  %v1052_v29 = vpop.f32.mrf.mxu0 }
 0x116   :  { %v474_v30 = vadd.f32 %v1090_v26, %v409_v25  ;;  %v1053_v31 = vadd.f32 %v1052_v29, %v1051_v23  ;;  %v1092_v35 = vpop.f32.mrf.mxu1  ;;  %v503_v39 = vmul.f32 %v1140_v28, %v1019_v24 }
 0x117   :  { %v1054_v40 = vpop.f32.mrf.mxu0  ;;  %v1093_v48 = vadd.f32 %v1092_v35, %v1091_v27 }
 0x118   :  { %1147 = vtanh.f32 %v474_v30  ;;  %v412_v44 = vadd.f32 %v1053_v31, %v1390_v18  ;;  %v1094_v49 = vpop.f32.mrf.mxu1  ;;  %511 = vadd.xlane.f32.xlu0 %v503_v39 }
 0x119   :  { %v1142_v58 = vpop.eup %1141  ;;  %v1055_v59 = vpop.f32.mrf.mxu0 }
 0x11a   :  { %v477_v60 = vadd.f32 %v1093_v48, %v412_v44  ;;  %v1056_v61 = vadd.f32 %v1055_v59, %v1054_v40  ;;  %v1095_v6 = vpop.f32.mrf.mxu1  ;;  %v504_v7 = vmul.f32 %v1142_v58, %v1019_v24 }
 0x11b   :  { %v1057_v8 = vpop.f32.mrf.mxu0  ;;  %v1096_v14 = vadd.f32 %v1095_v6, %v1094_v49 }
 0x11c   :  { %1149 = vtanh.f32 %v477_v60  ;;  %v417_v9 = vadd.f32 %v1056_v61, %v1390_v18  ;;  %v1097_v15 = vpop.f32.mrf.mxu1  ;;  %513 = vadd.xlane.f32.xlu0 %v504_v7 }
 0x11d   :  { %v1144_v16 = vpop.eup %1143  ;;  %v1058_v17 = vpop.f32.mrf.mxu0 }
 0x11e   :  { %v482_v19 = vadd.f32 %v1096_v14, %v417_v9  ;;  %v1059_v20 = vadd.f32 %v1058_v17, %v1057_v8  ;;  %v1098_v21 = vpop.f32.mrf.mxu1  ;;  %v505_v22 = vmul.f32 %v1144_v16, %v1019_v24 }
 0x11f   :  { %v1099_v25 = vadd.f32 %v1098_v21, %v1097_v15 }
 0x120   :  { %1151 = vtanh.f32 %v482_v19  ;;  %v420_v23 = vadd.f32 %v1059_v20, %v1390_v18  ;;  %515 = vadd.xlane.f32.xlu1 %v505_v22 }
 0x121   :  { %v1146_v26 = vpop.eup %1145 }
 0x122   :  { %v485_v27 = vadd.f32 %v1099_v25, %v420_v23  ;;  %v506_v28 = vmul.f32 %v1146_v26, %v1019_v24 }
 0x124   :  { %1153 = vtanh.f32 %v485_v27  ;;  %517 = vadd.xlane.f32.xlu1 %v506_v28 }
 0x125   :  { %v1148_v29 = vpop.eup %1147 }
 0x126   :  { %v507_v30 = vmul.f32 %v1148_v29, %v1019_v24 }
 0x128   :  { %519 = vadd.xlane.f32.xlu0 %v507_v30 }
 0x129   :  { %v1150_v31 = vpop.eup %1149 }
 0x12a   :  { %v508_v35 = vmul.f32 %v1150_v31, %v1019_v24 }
 0x12c   :  { %521 = vadd.xlane.f32.xlu1 %v508_v35 }
 0x12d   :  { %v1152_v39 = vpop.eup %1151 }
 0x12e   :  { %v509_v40 = vmul.f32 %v1152_v39, %v1019_v24 }
 0x130   :  { %523 = vadd.xlane.f32.xlu0 %v509_v40 }
 0x131   :  { %v1154_v44 = vpop.eup %1153 }
 0x132   :  { %v510_v48 = vmul.f32 %v1154_v44, %v1019_v24 }
 0x134   :  { %525 = vadd.xlane.f32.xlu1 %v510_v48 }
 0x1a1   :  { %v512_v18 = vpop.xlane.xlu0 %511 }
 0x1a2   :  { %v527_v49 = vrot.slane %v512_v18, 4 }
 0x1a4   :  { %v528_v58 = vmax.f32 %v512_v18, %v527_v49 }
 0x1a5   :  { %v514_v59 = vpop.xlane.xlu0 %513 }
 0x1a6   :  { %v529_v60 = vrot.slane %v528_v58, 2  ;;  %v533_v61 = vrot.slane %v514_v59, 4 }
 0x1a8   :  { %v530_v6 = vmax.f32 %v528_v58, %v529_v60  ;;  %v534_v7 = vmax.f32 %v514_v59, %v533_v61 }
 0x1a9   :  { %v516_v8 = vpop.xlane.xlu1 %515 }
 0x1aa   :  { %v531_v9 = vrot.slane %v530_v6, 1  ;;  %v535_v14 = vrot.slane %v534_v7, 2  ;;  %v539_v15 = vrot.slane %v516_v8, 4 }
 0x1ac   :  { %v532_v16 = vmax.f32 %v530_v6, %v531_v9  ;;  %v536_v17 = vmax.f32 %v534_v7, %v535_v14  ;;  %v540_v19 = vmax.f32 %v516_v8, %v539_v15 }
 0x1ad   :  { %v518_v20 = vpop.xlane.xlu1 %517 }
 0x1ae   :  { %v575_v21 = vsub.f32 %v512_v18, %v532_v16  ;;  %v537_v22 = vrot.slane %v536_v17, 1  ;;  %v541_v24 = vrot.slane %v540_v19, 2  ;;  %v545_v23 = vrot.slane %v518_v20, 4 }
 0x1b0   :  { %v583_v25 = vmul.f32 1.442695, %v575_v21  ;;  %v538_v26 = vmax.f32 %v536_v17, %v537_v22  ;;  %v542_v27 = vmax.f32 %v540_v19, %v541_v24  ;;  %v546_v28 = vmax.f32 %v518_v20, %v545_v23 }
 0x1b1   :  { %v520_v29 = vpop.xlane.xlu0 %519 }
 0x1b2   :  { %1155 = vpow2.f32 %v583_v25  ;;  %v576_v30 = vsub.f32 %v514_v59, %v538_v26  ;;  %v543_v31 = vrot.slane %v542_v27, 1  ;;  %v547_v35 = vrot.slane %v546_v28, 2 }
 0x1b3   :  { %v551_v39 = vrot.slane %v520_v29, 4 }
 0x1b4   :  { %v585_v40 = vmul.f32 1.442695, %v576_v30  ;;  %v544_v44 = vmax.f32 %v542_v27, %v543_v31  ;;  %v548_v48 = vmax.f32 %v546_v28, %v547_v35 }
 0x1b5   :  { %v552_v49 = vmax.f32 %v520_v29, %v551_v39  ;;  %v522_v58 = vpop.xlane.xlu1 %521 }
 0x1b6   :  { %1157 = vpow2.f32 %v585_v40  ;;  %v577_v18 = vsub.f32 %v516_v8, %v544_v44  ;;  %v549_v60 = vrot.slane %v548_v48, 1  ;;  %v557_v61 = vrot.slane %v522_v58, 4 }
 0x1b7   :  { %v553_v6 = vrot.slane %v552_v49, 2 }
 0x1b8   :  { %v587_v7 = vmul.f32 1.442695, %v577_v18  ;;  %v550_v9 = vmax.f32 %v548_v48, %v549_v60  ;;  %v558_v14 = vmax.f32 %v522_v58, %v557_v61 }
 0x1b9   :  { %v554_v15 = vmax.f32 %v552_v49, %v553_v6  ;;  %v524_v16 = vpop.xlane.xlu0 %523 }
 0x1ba   :  { %1159 = vpow2.f32 %v587_v7  ;;  %v578_v59 = vsub.f32 %v518_v20, %v550_v9  ;;  %v559_v17 = vrot.slane %v558_v14, 2  ;;  %v563_v19 = vrot.slane %v524_v16, 4 }
 0x1bb   :  { %v555_v21 = vrot.slane %v554_v15, 1 }
 0x1bc   :  { %v589_v22 = vmul.f32 1.442695, %v578_v59  ;;  %v560_v24 = vmax.f32 %v558_v14, %v559_v17  ;;  %v564_v23 = vmax.f32 %v524_v16, %v563_v19 }
 0x1bd   :  { %v556_v25 = vmax.f32 %v554_v15, %v555_v21  ;;  %v526_v26 = vpop.xlane.xlu1 %525 }
 0x1be   :  { %1161 = vpow2.f32 %v589_v22  ;;  %v561_v8 = vrot.slane %v560_v24, 1  ;;  %v565_v27 = vrot.slane %v564_v23, 2  ;;  %v569_v28 = vrot.slane %v526_v26, 4 }
 0x1bf   :  { %v1403_v30 = vpop.eup %1155  ;;  %v579_v31 = vsub.f32 %v520_v29, %v556_v25 }
 0x1c0   :  { %v599_v35 = vrot.slane %v1403_v30, 4  ;;  %v562_v39 = vmax.f32 %v560_v24, %v561_v8  ;;  %v566_v40 = vmax.f32 %v564_v23, %v565_v27  ;;  %v570_v20 = vmax.f32 %v526_v26, %v569_v28 }
 0x1c1   :  { %v591_v44 = vmul.f32 1.442695, %v579_v31 }
 0x1c2   :  { %v600_v48 = vadd.f32 %v1403_v30, %v599_v35  ;;  %v580_v49 = vsub.f32 %v522_v58, %v562_v39  ;;  %v567_v18 = vrot.slane %v566_v40, 1  ;;  %v571_v60 = vrot.slane %v570_v20, 2 }
 0x1c3   :  { %v1407_v61 = vpop.eup %1157  ;;  %1163 = vpow2.f32 %v591_v44 }
 0x1c4   :  { %v601_v6 = vrot.slane %v600_v48, 2  ;;  %v605_v7 = vrot.slane %v1407_v61, 4  ;;  %v593_v9 = vmul.f32 1.442695, %v580_v49  ;;  %v568_v14 = vmax.f32 %v566_v40, %v567_v18 }
 0x1c5   :  { %v572_v29 = vmax.f32 %v570_v20, %v571_v60 }
 0x1c6   :  { %v602_v15 = vadd.f32 %v601_v6, %v600_v48  ;;  %v606_v59 = vadd.f32 %v1407_v61, %v605_v7  ;;  %1165 = vpow2.f32 %v593_v9  ;;  %v581_v17 = vsub.f32 %v524_v16, %v568_v14 }
 0x1c7   :  { %v1411_v19 = vpop.eup %1159  ;;  %v573_v21 = vrot.slane %v572_v29, 1 }
 0x1c8   :  { %v603_v58 = vrot.slane %v602_v15, 1  ;;  %v607_v22 = vrot.slane %v606_v59, 2  ;;  %v611_v24 = vrot.slane %v1411_v19, 4  ;;  %v595_v23 = vmul.f32 1.442695, %v581_v17 }
 0x1c9   :  { %v574_v25 = vmax.f32 %v572_v29, %v573_v21 }
 0x1ca   :  { %v604_v8 = vadd.f32 %v603_v58, %v602_v15  ;;  %v608_v27 = vadd.f32 %v607_v22, %v606_v59  ;;  %v612_v28 = vadd.f32 %v1411_v19, %v611_v24  ;;  %1167 = vpow2.f32 %v595_v23 }
 0x1cb   :  { %v1415_v31 = vpop.eup %1161  ;;  %v582_v35 = vsub.f32 %v526_v26, %v574_v25 }
 0x1cc   :  { %1169 = vrcp.f32 %v604_v8  ;;  %v609_v39 = vrot.slane %v608_v27, 1  ;;  %v613_v16 = vrot.slane %v612_v28, 2  ;;  %v617_v40 = vrot.slane %v1415_v31, 4 }
 0x1cd   :  { %v597_v20 = vmul.f32 1.442695, %v582_v35 }
 0x1ce   :  { %v610_v44 = vadd.f32 %v609_v39, %v608_v27  ;;  %v614_v48 = vadd.f32 %v613_v16, %v612_v28  ;;  %v618_v49 = vadd.f32 %v1415_v31, %v617_v40 }
 0x1cf   :  { %1171 = vpow2.f32 %v597_v20 }
 0x1d0   :  { %v1419_v18 = vpop.eup %1163  ;;  %1173 = vrcp.f32 %v610_v44  ;;  %v615_v60 = vrot.slane %v614_v48, 1  ;;  %v619_v6 = vrot.slane %v618_v49, 2 }
 0x1d1   :  { %v623_v7 = vrot.slane %v1419_v18, 4 }
 0x1d2   :  { %v616_v9 = vadd.f32 %v615_v60, %v614_v48  ;;  %v620_v26 = vadd.f32 %v619_v6, %v618_v49 }
 0x1d3   :  { %v1422_v14 = vpop.eup %1165  ;;  %v624_v29 = vadd.f32 %v1419_v18, %v623_v7 }
 0x1d4   :  { %1175 = vrcp.f32 %v616_v9  ;;  %v621_v15 = vrot.slane %v620_v26, 1  ;;  %v629_v59 = vrot.slane %v1422_v14, 4 }
 0x1d5   :  { %v625_v17 = vrot.slane %v624_v29, 2 }
 0x1d6   :  { %v622_v21 = vadd.f32 %v621_v15, %v620_v26  ;;  %v630_v58 = vadd.f32 %v1422_v14, %v629_v59 }
 0x1d7   :  { %v1427_v22 = vpop.eup %1167  ;;  %v626_v24 = vadd.f32 %v625_v17, %v624_v29 }
 0x1d8   :  { %1177 = vrcp.f32 %v622_v21  ;;  %v631_v23 = vrot.slane %v630_v58, 2  ;;  %v635_v25 = vrot.slane %v1427_v22, 4 }
 0x1d9   :  { %v1170_v8 = vpop.eup %1169  ;;  %v627_v27 = vrot.slane %v626_v24, 1 }
 0x1da   :  { %v663_v28 = vmul.f32 %v1170_v8, %v1403_v30  ;;  %v632_v35 = vadd.f32 %v631_v23, %v630_v58  ;;  %v636_v39 = vadd.f32 %v1427_v22, %v635_v25 }
 0x1db   :  { %v628_v16 = vadd.f32 %v627_v27, %v626_v24 }
 0x1dc   :  { %v1432_v40 = vpop.eup %1171  ;;  %v633_v20 = vrot.slane %v632_v35, 1  ;;  %v637_v44 = vrot.slane %v636_v39, 2  ;;  %v671_v48 = vmul.f32 %v663_v28, %v1301_v37  ;;  %v672_v49 = vmul.f32 %v663_v28, %v1291_v32 }
 0x1dd   :  { %v1174_v60 = vpop.eup %1173  ;;  %1179 = vrcp.f32 %v628_v16  ;;  %v641_v6 = vrot.slane %v1432_v40, 4  ;;  %v673_v7 = vmul.f32 %v663_v28, %v1309_v41  ;;  %v674_v30 = vmul.f32 %v663_v28, %v1295_v34 }
 0x1de   :  { %v664_v9 = vmul.f32 %v1174_v60, %v1407_v61  ;;  %v634_v26 = vadd.f32 %v633_v20, %v632_v35  ;;  %v638_v29 = vadd.f32 %v637_v44, %v636_v39  ;;  %v703_v15 = vrot.slane %v671_v48, 4 }
 0x1df   :  { %v642_v59 = vadd.f32 %v1432_v40, %v641_v6  ;;  %v709_v17 = vrot.slane %v672_v49, 4  ;;  %v715_v21 = vrot.slane %v673_v7, 4  ;;  %v721_v37 = vrot.slane %v674_v30, 4 }
 0x1e0   :  { %1181 = vrcp.f32 %v634_v26  ;;  %v639_v32 = vrot.slane %v638_v29, 1  ;;  %v675_v58 = vmul.f32 %v664_v9, %v1303_v38  ;;  %v676_v24 = vmul.f32 %v664_v9, %v1293_v33 }
 0x1e1   :  { %v1176_v23 = vpop.eup %1175  ;;  %v643_v41 = vrot.slane %v642_v59, 2  ;;  %v677_v34 = vmul.f32 %v664_v9, %v1311_v42  ;;  %v678_v61 = vmul.f32 %v664_v9, %v1299_v36  ;;  %v704_v25 = vadd.f32 %v703_v15, %v671_v48 }
 0x1e2   :  { %v665_v8 = vmul.f32 %v1176_v23, %v1411_v19  ;;  %v640_v27 = vadd.f32 %v639_v32, %v638_v29  ;;  %v710_v28 = vadd.f32 %v709_v17, %v672_v49  ;;  %v716_v35 = vadd.f32 %v715_v21, %v673_v7 }
 0x1e3   :  { %v644_v39 = vadd.f32 %v643_v41, %v642_v59  ;;  %v705_v16 = vrot.slane %v704_v25, 2  ;;  %v722_v20 = vadd.f32 %v721_v37, %v674_v30  ;;  %v727_v44 = vrot.slane %v675_v58, 4 }
 0x1e4   :  { %1183 = vrcp.f32 %v640_v27  ;;  %v679_v38 = vmul.f32 %v665_v8, %v1327_v50  ;;  %v1448_v33 = vmul.f32 %v665_v8, %v1313_v43  ;;  %v1451_v42 = vmul.f32 %v665_v8, %v1331_v52 }
 0x1e5   :  { %v1178_v36 = vpop.eup %1177  ;;  %v645_v48 = vrot.slane %v644_v39, 1  ;;  %v1454_v19 = vmul.f32 %v665_v8, %v1319_v46  ;;  %v706_v49 = vadd.f32 %v705_v16, %v704_v25  ;;  %v711_v60 = vrot.slane %v710_v28, 2 }
 0x1e6   :  { %v666_v6 = vmul.f32 %v1178_v36, %v1415_v31  ;;  %v717_v7 = vrot.slane %v716_v35, 2  ;;  %v723_v30 = vrot.slane %v722_v20, 2  ;;  %v728_v9 = vadd.f32 %v727_v44, %v675_v58 }
 0x1e7   :  { %v646_v26 = vadd.f32 %v645_v48, %v644_v39  ;;  %v707_v50 = vrot.slane %v706_v49, 1  ;;  %v712_v29 = vadd.f32 %v711_v60, %v710_v28  ;;  %v733_v43 = vrot.slane %v676_v24, 4 }
 0x1e8   :  { %v1458_v15 = vmul.f32 %v666_v6, %v1329_v51  ;;  %v1461_v52 = vmul.f32 %v666_v6, %v1317_v45  ;;  %v1464_v46 = vmul.f32 %v666_v6, %v1333_v53  ;;  %v1467_v59 = vmul.f32 %v666_v6, %v1321_v47 }
 0x1e9   :  { %1185 = vrcp.f32 %v646_v26  ;;  %v1469_v31 = vadd.f32 %v707_v50, %v706_v49  ;;  %v713_v17 = vrot.slane %v712_v29, 1  ;;  %v718_v21 = vadd.f32 %v717_v7, %v716_v35 }
 0x1ea   :  { %v1180_v37 = vpop.eup %1179  ;;  %v724_v32 = vadd.f32 %v723_v30, %v722_v20  ;;  %v729_v58 = vrot.slane %v728_v9, 2  ;;  %v734_v23 = vadd.f32 %v733_v43, %v676_v24  ;;  %v739_v51 = vrot.slane %v677_v34, 4 }
 0x1eb   :  { %v667_v41 = vmul.f32 %v1180_v37, %v1419_v18  ;;  %v1472_v45 = vadd.f32 %v713_v17, %v712_v29  ;;  %v719_v25 = vrot.slane %v718_v21, 1  ;;  %v745_v53 = vrot.slane %v678_v61, 4 }
 0x1ec   :  { %v725_v8 = vrot.slane %v724_v32, 1  ;;  %v730_v27 = vadd.f32 %v729_v58, %v728_v9  ;;  %v735_v47 = vrot.slane %v734_v23, 2  ;;  %v740_v28 = vadd.f32 %v739_v51, %v677_v34 }
 0x1ed   :  { %v1182_v39 = vpop.eup %1181  ;;  %v1475_v16 = vmul.f32 %v667_v41, %v1351_v62  ;;  %v1478_v35 = vmul.f32 %v667_v41, %v1335_v54  ;;  %v1481_v24 = vmul.f32 %v667_v41, %v1355_v0  ;;  %v1484_v18 = vmul.f32 %v667_v41, %v1339_v56 }
 0x1ee   :  { %v668_v20 = vmul.f32 %v1182_v39, %v1422_v14  ;;  %v1487_v44 = vadd.f32 %v719_v25, %v718_v21  ;;  %v1489_v36 = vadd.f32 %v725_v8, %v724_v32  ;;  %v731_v34 = vrot.slane %v730_v27, 1 }
 0x1ef   :  { %v736_v48 = vadd.f32 %v735_v47, %v734_v23  ;;  %v741_v49 = vrot.slane %v740_v28, 2  ;;  %v746_v62 = vadd.f32 %v745_v53, %v678_v61  ;;  %v751_v60 = vrot.slane %v679_v38, 4 }
 0x1f0   :  { %v1492_v54 = vmul.f32 %v668_v20, %v1353_v63  ;;  %v1495_v0 = vmul.f32 %v668_v20, %v1337_v55  ;;  %v1498_v56 = vmul.f32 %v668_v20, %v1357_v1  ;;  %v1501_v14 = vmul.f32 %v668_v20, %v1341_v57 }
 0x1f1   :  { %v1184_v6 = vpop.eup %1183  ;;  %v1503_v7 = vadd.f32 %v731_v34, %v730_v27  ;;  %v737_v30 = vrot.slane %v736_v48, 1  ;;  %v742_v9 = vadd.f32 %v741_v49, %v740_v28  ;;  %v747_v26 = vrot.slane %v746_v62, 2 }
 0x1f2   :  { %v669_v61 = vmul.f32 %v1184_v6, %v1427_v22  ;;  %v752_v50 = vadd.f32 %v751_v60, %v679_v38  ;;  %v757_v63 = vrot.slane %v1448_v33, 4  ;;  %v763_v55 = vrot.slane %v1451_v42, 4 }
 0x1f3   :  { %v1508_v29 = vadd.f32 %v737_v30, %v736_v48  ;;  %v743_v1 = vrot.slane %v742_v9, 1  ;;  %v748_v43 = vadd.f32 %v747_v26, %v746_v62  ;;  %v769_v57 = vrot.slane %v1454_v19, 4 }
 0x1f4   :  { %v1512_v17 = vmul.f32 %v669_v61, %v1375_v10  ;;  %v1515_v21 = vmul.f32 %v669_v61, %v1359_v2  ;;  %v1518_v37 = vmul.f32 %v669_v61, %v1379_v12  ;;  %v1521_v22 = vmul.f32 %v669_v61, %v1363_v4 }
 0x1f5   :  { %v1523_v38 = vadd.f32 %v743_v1, %v742_v9  ;;  %v749_v32 = vrot.slane %v748_v43, 1  ;;  %v753_v58 = vrot.slane %v752_v50, 2  ;;  %v758_v23 = vadd.f32 %v757_v63, %v1448_v33 }
 0x1f6   :  { %v1186_v51 = vpop.eup %1185  ;;  %v764_v41 = vadd.f32 %v763_v55, %v1451_v42  ;;  %v770_v10 = vadd.f32 %v769_v57, %v1454_v19  ;;  %v775_v2 = vrot.slane %v1458_v15, 4  ;;  %v781_v25 = vrot.slane %v1461_v52, 4 }
 0x1f7   :  { %v670_v12 = vmul.f32 %v1186_v51, %v1432_v40  ;;  %v1531_v53 = vadd.f32 %v749_v32, %v748_v43  ;;  %v754_v4 = vadd.f32 %v753_v58, %v752_v50  ;;  %v759_v8 = vrot.slane %v758_v23, 2 }
 0x1f8   :  { %v765_v27 = vrot.slane %v764_v41, 2  ;;  %v771_v47 = vrot.slane %v770_v10, 2  ;;  %v776_v28 = vadd.f32 %v775_v2, %v1458_v15  ;;  %v782_v33 = vadd.f32 %v781_v25, %v1461_v52 }
 0x1f9   :  { %v1536_v42 = vmul.f32 %v670_v12, %v1377_v11  ;;  %v1539_v19 = vmul.f32 %v670_v12, %v1361_v3  ;;  %v1542_v39 = vmul.f32 %v670_v12, %v1381_v13  ;;  %v1545_v40 = vmul.f32 %v670_v12, %v1365_v5 }
 0x1fa   :  { %v755_v20 = vrot.slane %v754_v4, 1  ;;  %v760_v34 = vadd.f32 %v759_v8, %v758_v23  ;;  %v766_v48 = vadd.f32 %v765_v27, %v764_v41  ;;  %v772_v49 = vadd.f32 %v771_v47, %v770_v10 }
 0x1fb   :  { %v777_v62 = vrot.slane %v776_v28, 2  ;;  %v783_v15 = vrot.slane %v782_v33, 2  ;;  %v787_v52 = vrot.slane %v1464_v46, 4  ;;  %v793_v11 = vrot.slane %v1467_v59, 4 }
 0x1fc   :  { %v1549_v60 = vadd.f32 %v755_v20, %v754_v4  ;;  %v761_v3 = vrot.slane %v760_v34, 1  ;;  %v767_v6 = vrot.slane %v766_v48, 1  ;;  %v773_v30 = vrot.slane %v772_v49, 1 }
 0x1fd   :  { %v778_v13 = vadd.f32 %v777_v62, %v776_v28  ;;  %v784_v9 = vadd.f32 %v783_v15, %v782_v33  ;;  %v788_v5 = vadd.f32 %v787_v52, %v1464_v46  ;;  %v794_v26 = vadd.f32 %v793_v11, %v1467_v59 }
 0x1fe   :  { %v1553_v61 = vadd.f32 %v761_v3, %v760_v34  ;;  %v1555_v50 = vadd.f32 %v767_v6, %v766_v48  ;;  %v1557_v63 = vadd.f32 %v773_v30, %v772_v49  ;;  %v799_v55 = vrot.slane %v1475_v16, 4 }
 0x1ff   :  { %v779_v1 = vrot.slane %v778_v13, 1  ;;  %v785_v43 = vrot.slane %v784_v9, 1  ;;  %v789_v57 = vrot.slane %v788_v5, 2  ;;  %v795_v32 = vrot.slane %v794_v26, 2 }
 0x200   :  { %v800_v58 = vadd.f32 %v799_v55, %v1475_v16  ;;  %v805_v23 = vrot.slane %v1478_v35, 4  ;;  %v811_v46 = vrot.slane %v1481_v24, 4  ;;  %v817_v59 = vrot.slane %v1484_v18, 4 }
 0x201   :  { %v1564_v51 = vadd.f32 %v779_v1, %v778_v13  ;;  %v1566_v41 = vadd.f32 %v785_v43, %v784_v9  ;;  %v790_v10 = vadd.f32 %v789_v57, %v788_v5  ;;  %v796_v2 = vadd.f32 %v795_v32, %v794_v26 }
 0x202   :  { %v801_v25 = vrot.slane %v800_v58, 2  ;;  %v806_v12 = vadd.f32 %v805_v23, %v1478_v35  ;;  %v812_v4 = vadd.f32 %v811_v46, %v1481_v24  ;;  %v818_v8 = vadd.f32 %v817_v59, %v1484_v18 }
 0x203   :  { %v791_v16 = vrot.slane %v790_v10, 1  ;;  %v797_v27 = vrot.slane %v796_v2, 1  ;;  %v823_v47 = vrot.slane %v1492_v54, 4  ;;  %v829_v28 = vrot.slane %v1495_v0, 4 }
 0x204   :  { %v802_v33 = vadd.f32 %v801_v25, %v800_v58  ;;  %v807_v20 = vrot.slane %v806_v12, 2  ;;  %v813_v34 = vrot.slane %v812_v4, 2  ;;  %v819_v48 = vrot.slane %v818_v8, 2 }
 0x205   :  { %v1573_v49 = vadd.f32 %v791_v16, %v790_v10  ;;  %v1575_v62 = vadd.f32 %v797_v27, %v796_v2  ;;  %v824_v35 = vadd.f32 %v823_v47, %v1492_v54  ;;  %v830_v24 = vadd.f32 %v829_v28, %v1495_v0 }
 0x206   :  { %v803_v15 = vrot.slane %v802_v33, 1  ;;  %v808_v18 = vadd.f32 %v807_v20, %v806_v12  ;;  %v814_v52 = vadd.f32 %v813_v34, %v812_v4  ;;  %v820_v11 = vadd.f32 %v819_v48, %v818_v8 }
 0x207   :  { %v825_v3 = vrot.slane %v824_v35, 2  ;;  %v831_v6 = vrot.slane %v830_v24, 2  ;;  %v835_v30 = vrot.slane %v1498_v56, 4  ;;  %v841_v13 = vrot.slane %v1501_v14, 4 }
 0x208   :  { %v1581_v9 = vadd.f32 %v803_v15, %v802_v33  ;;  %v809_v5 = vrot.slane %v808_v18, 1  ;;  %v815_v26 = vrot.slane %v814_v52, 1  ;;  %v821_v55 = vrot.slane %v820_v11, 1 }
 0x209   :  { %v826_v1 = vadd.f32 %v825_v3, %v824_v35  ;;  %v832_v43 = vadd.f32 %v831_v6, %v830_v24  ;;  %v836_v54 = vadd.f32 %v835_v30, %v1498_v56  ;;  %v842_v0 = vadd.f32 %v841_v13, %v1501_v14 }
 0x20a   :  { %v1585_v57 = vadd.f32 %v809_v5, %v808_v18  ;;  %v1587_v32 = vadd.f32 %v815_v26, %v814_v52  ;;  %v1589_v58 = vadd.f32 %v821_v55, %v820_v11  ;;  %v847_v23 = vrot.slane %v1512_v17, 4 }
 0x20b   :  { %v827_v46 = vrot.slane %v826_v1, 1  ;;  %v833_v59 = vrot.slane %v832_v43, 1  ;;  %v837_v10 = vrot.slane %v836_v54, 2  ;;  %v843_v2 = vrot.slane %v842_v0, 2 }
 0x20c   :  { %v848_v25 = vadd.f32 %v847_v23, %v1512_v17  ;;  %v853_v12 = vrot.slane %v1515_v21, 4  ;;  %v859_v56 = vrot.slane %v1518_v37, 4  ;;  %v865_v14 = vrot.slane %v1521_v22, 4 }
 0x20d   :  { %v1596_v4 = vadd.f32 %v827_v46, %v826_v1  ;;  %v1598_v8 = vadd.f32 %v833_v59, %v832_v43  ;;  %v838_v16 = vadd.f32 %v837_v10, %v836_v54  ;;  %v844_v27 = vadd.f32 %v843_v2, %v842_v0 }
 0x20e   :  { %v849_v47 = vrot.slane %v848_v25, 2  ;;  %v854_v28 = vadd.f32 %v853_v12, %v1515_v21  ;;  %v860_v33 = vadd.f32 %v859_v56, %v1518_v37  ;;  %v866_v17 = vadd.f32 %v865_v14, %v1521_v22 }
 0x20f   :  { %v839_v20 = vrot.slane %v838_v16, 1  ;;  %v845_v34 = vrot.slane %v844_v27, 1  ;;  %v871_v48 = vrot.slane %v1536_v42, 4  ;;  %v877_v35 = vrot.slane %v1539_v19, 4 }
 0x210   :  { %v850_v24 = vadd.f32 %v849_v47, %v848_v25  ;;  %v855_v15 = vrot.slane %v854_v28, 2  ;;  %v861_v18 = vrot.slane %v860_v33, 2  ;;  %v867_v52 = vrot.slane %v866_v17, 2 }
 0x211   :  { %v1605_v11 = vadd.f32 %v839_v20, %v838_v16  ;;  %v1607_v3 = vadd.f32 %v845_v34, %v844_v27  ;;  %v872_v21 = vadd.f32 %v871_v48, %v1536_v42  ;;  %v878_v37 = vadd.f32 %v877_v35, %v1539_v19 }
 0x212   :  { %v851_v22 = vrot.slane %v850_v24, 1  ;;  %v856_v6 = vadd.f32 %v855_v15, %v854_v28  ;;  %v862_v30 = vadd.f32 %v861_v18, %v860_v33  ;;  %v868_v13 = vadd.f32 %v867_v52, %v866_v17 }
 0x213   :  { %v873_v5 = vrot.slane %v872_v21, 2  ;;  %v879_v26 = vrot.slane %v878_v37, 2  ;;  %v883_v55 = vrot.slane %v1542_v39, 4  ;;  %v889_v1 = vrot.slane %v1545_v40, 4 }
 0x214   :  { %v852_v43 = vadd.f32 %v851_v22, %v850_v24  ;;  %v857_v54 = vrot.slane %v856_v6, 1  ;;  %v863_v0 = vrot.slane %v862_v30, 1  ;;  %v869_v23 = vrot.slane %v868_v13, 1 }
 0x215   :  { %v874_v42 = vadd.f32 %v873_v5, %v872_v21  ;;  %v880_v46 = vadd.f32 %v879_v26, %v878_v37  ;;  %v884_v19 = vadd.f32 %v883_v55, %v1542_v39  ;;  %v890_v59 = vadd.f32 %v889_v1, %v1545_v40 }
 0x216   :  { %v858_v10 = vadd.f32 %v857_v54, %v856_v6  ;;  %v864_v2 = vadd.f32 %v863_v0, %v862_v30  ;;  %v870_v25 = vadd.f32 %v869_v23, %v868_v13  ;;  %v928_v12 = vsel %vm927_vm0, %v1503_v7, %v1469_v31 }
 0x217   :  { %v875_v56 = vrot.slane %v874_v42, 1  ;;  %v881_v14 = vrot.slane %v880_v46, 1  ;;  %v885_v16 = vrot.slane %v884_v19, 2  ;;  %v891_v27 = vrot.slane %v890_v59, 2 }
 0x218   :  { %v930_v47 = vsel %vm929_vm1, %v1549_v60, %v928_v12  ;;  %v941_v39 = vsel %vm927_vm0, %v1508_v29, %v1472_v45  ;;  %v948_v40 = vsel %vm927_vm0, %v1523_v38, %v1487_v44  ;;  %v955_v28 = vsel %vm927_vm0, %v1531_v53, %v1489_v36 }
 0x219   :  { %v876_v31 = vadd.f32 %v875_v56, %v874_v42  ;;  %v882_v7 = vadd.f32 %v881_v14, %v880_v46  ;;  %v886_v33 = vadd.f32 %v885_v16, %v884_v19  ;;  %v892_v17 = vadd.f32 %v891_v27, %v890_v59 }
 0x21a   :  { %v932_v20 = vsel %vm931_vm2, %v1564_v51, %v930_v47  ;;  %v942_v60 = vsel %vm929_vm1, %v1553_v61, %v941_v39  ;;  %v949_v45 = vsel %vm929_vm1, %v1555_v50, %v948_v40  ;;  %v956_v44 = vsel %vm929_vm1, %v1557_v63, %v955_v28 }
 0x21b   :  { %v887_v29 = vrot.slane %v886_v33, 1  ;;  %v893_v38 = vrot.slane %v892_v17, 1  ;;  %v934_v36 = vsel %vm933_vm3, %v1581_v9, %v932_v20  ;;  %v943_v53 = vsel %vm931_vm2, %v1566_v41, %v942_v60 }
 0x21c   :  { %v936_v51 = vsel %vm935_vm4, %v1596_v4, %v934_v36  ;;  %v944_v61 = vsel %vm933_vm3, %v1585_v57, %v943_v53  ;;  %v950_v50 = vsel %vm931_vm2, %v1573_v49, %v949_v45  ;;  %v957_v63 = vsel %vm931_vm2, %v1575_v62, %v956_v44 }
 0x21d   :  { %v888_v34 = vadd.f32 %v887_v29, %v886_v33  ;;  %v894_v48 = vadd.f32 %v893_v38, %v892_v17  ;;  %v938_v35 = vsel %vm937_vm5, %v852_v43, %v936_v51  ;;  %v945_v9 = vsel %vm935_vm4, %v1598_v8, %v944_v61 }
 0x21e   :  { %v940_v41 = vsel %vm939_vm6, %v876_v31, %v938_v35  ;;  %v946_v4 = vsel %vm937_vm5, %v858_v10, %v945_v9  ;;  %v951_v57 = vsel %vm933_vm3, %v1587_v32, %v950_v50  ;;  %v958_v49 = vsel %vm933_vm3, %v1589_v58, %v957_v63 }
 0x21f   :  { %v947_v62 = vsel %vm939_vm6, %v882_v7, %v946_v4  ;;  %v952_v24 = vsel %vm935_vm4, %v1605_v11, %v951_v57  ;;  %v959_v8 = vsel %vm935_vm4, %v1607_v3, %v958_v49  ;;  %966 = vst [vmem:[#allocation7] sm:$0xff] %v940_v41 }
 0x220   :  { %v953_v15 = vsel %vm937_vm5, %v864_v2, %v952_v24  ;;  %v960_v18 = vsel %vm937_vm5, %v870_v25, %v959_v8  ;;  %967 = vst [vmem:[#allocation7 + $0x8] sm:$0xff] %v947_v62 }
 0x221   :  { %v954_v32 = vsel %vm939_vm6, %v888_v34, %v953_v15  ;;  %v961_v52 = vsel %vm939_vm6, %v894_v48, %v960_v18 }
 0x222   :  { %968 = vst [vmem:[#allocation7 + $0x10] sm:$0xff] %v954_v32  ;;  %969 = vst [vmem:[#allocation7 + $0x18] sm:$0xff] %v961_v52 }
 0x223   :  { %1238 = shalt.err (!%p1235_p0)
}
 0x224   :  { %979 = dma.vmem_to_hbm [thread:$0]  %s977_s30, 512, %s1674_s4, [#allocation4]  }
 0x225   :  { %1251 = dma.done.wait [#allocation4], 512  }
 0x226   :  { %1252 = vsyncadd [#allocation4], 4294966784 }
 0x227   :  { %983 = vsyncpa [#allocation3], 1 }
 0x228   :  { %984 = vsyncpa [#allocation6], 1 }
 0x229   :  { %985 = vsyncpa [#allocation4], 1 }

</bundles_post_ra>
